<compile_context>
chip_gen: v7x
topology: tpu7x:2x2x1
jax: 0.10.0
libtpu: 0.0.40
codegen_flags: <defaults>
</compile_context>

<pallas_src>
import functools

import jax
import jax.numpy as jnp
from jax.experimental import pallas as pl
from jax.experimental.pallas import tpu as pltpu

LANES = 128
SUBLANES = 8
NUM_SLICES = 2          # leading "parallel" grid axis: both TCs on v7x, no-op on v5e/v6e
MAX_TILE_ROWS = 8192    # 4 MiB f32 block -> 8 MiB double-buffered: safe on v7x VMEM


def _partial_sum_kernel(x_ref, o_ref, *, total_rows, need_mask):
    # x_ref: (tile_rows, 128) block of the flattened input (native dtype)
    # o_ref: (1, 8, 128) f32 partial sum for this slice; resident across the
    #        inner "arbitrary" grid axis, so it doubles as the accumulator.
    c = pl.program_id(0)   # slice (core) index
    i = pl.program_id(1)   # reduction step within the slice

    @pl.when(i == 0)
    def _():
        o_ref[...] = jnp.zeros_like(o_ref)

    x = x_ref[...].astype(jnp.float32)          # upcast in-kernel (bf16/fp8 friendly)
    tile_rows = x.shape[0]

    if need_mask:
        # Mask rows beyond the real (row-padded) input: Pallas does not
        # guarantee zeros for out-of-bounds rows of partial / overhanging blocks.
        block_idx = c * pl.num_programs(1) + i
        row_ids = block_idx * tile_rows + jax.lax.broadcasted_iota(
            jnp.int32, (tile_rows, LANES), 0)
        x = jnp.where(row_ids < total_rows, x, 0.0)

    # Fold the tile into the (8,128) vector accumulator: plain VPU vreg adds
    # that hide under the next tile's DMA.
    o_ref[0] += jnp.sum(x.reshape(-1, SUBLANES, LANES), axis=0)


@functools.partial(jax.jit, static_argnames=("tile_rows",))
def wasserstein_generator_loss(fake_disc_out: jax.Array, tile_rows: int = 2048) -> jax.Array:
    """Scalar f32 mean(fake_disc_out), computed with a Pallas TPU reduction."""
    x = fake_disc_out.reshape(-1)        # keep native dtype: min HBM bytes
    n_elems = x.shape[0]

    # Pad only to a lane multiple (128); skipped entirely when already aligned.
    pad = (-n_elems) % LANES
    if pad:
        x = jnp.pad(x, (0, pad))
    x2d = x.reshape(-1, LANES)           # (rows, 128)
    rows = x2d.shape[0]

    # Effective row-tile: multiple of 8 sublanes, capped, no larger than the slab.
    rows_up8 = ((rows + SUBLANES - 1) // SUBLANES) * SUBLANES
    tr = max(SUBLANES, min(int(tile_rows), MAX_TILE_ROWS, rows_up8))
    tr = ((tr + SUBLANES - 1) // SUBLANES) * SUBLANES

    num_blocks = -(-rows // tr)                     # blocks covering the slab
    bps = -(-num_blocks // NUM_SLICES)              # blocks per slice
    need_mask = (NUM_SLICES * bps * tr) != rows     # ragged or overhanging blocks

    kernel = functools.partial(_partial_sum_kernel, total_rows=rows, need_mask=need_mask)

    partials = pl.pallas_call(
        kernel,
        out_shape=jax.ShapeDtypeStruct((NUM_SLICES, SUBLANES, LANES), jnp.float32),
        grid_spec=pltpu.PrefetchScalarGridSpec(
            num_scalar_prefetch=0,
            grid=(NUM_SLICES, bps),
            in_specs=[
                pl.BlockSpec(
                    (tr, LANES),
                    # Clamp so steps past the end re-read (and fully mask) the
                    # last valid block instead of reading out of bounds.
                    lambda c, i: (jnp.minimum(c * bps + i, num_blocks - 1), 0),
                ),
            ],
            out_specs=pl.BlockSpec((1, SUBLANES, LANES), lambda c, i: (c, 0, 0)),
        ),
        compiler_params=pltpu.CompilerParams(
            dimension_semantics=("parallel", "arbitrary"),
            vmem_limit_bytes=32 * 1024 * 1024,
        ),
        cost_estimate=pl.CostEstimate(
            flops=n_elems,
            transcendentals=0,
            bytes_accessed=n_elems * x.dtype.itemsize
            + NUM_SLICES * SUBLANES * LANES * 4,
        ),
    )(x2d)

    # Tiny epilogue: combine per-slice vector partials, divide by the true count.
    return jnp.sum(partials) / jnp.float32(n_elems)


if __name__ == "__main__":
    key = jax.random.PRNGKey(0)
    # Synthetic discriminator output for fake data, NCHW-like shape.
    fake_out = jax.random.normal(key, (2, 4, 16, 16), dtype=jnp.float32)

    loss = wasserstein_generator_loss(fake_out)
    loss = jax.block_until_ready(loss)

    ref = jnp.mean(fake_out)
    assert jnp.allclose(loss, ref, atol=1e-6, rtol=1e-6), (loss, ref)
    print("KERNEL_OK")
</pallas_src>

<mosaic_0001>
module attributes {stable_mosaic.version = 11 : i64} {
  func.func @_partial_sum_kernel(%arg0: i32, %arg1: i32, %arg2: memref<16x128xf32, #tpu.memory_space<vmem>>, %arg3: memref<1x8x128xf32, #tpu.memory_space<vmem>>) attributes {dimension_semantics = [#tpu.dimension_semantics<parallel>, #tpu.dimension_semantics<arbitrary>], iteration_bounds = array<i64: 2, 1>, scalar_prefetch = 0 : i64, scratch_operands = 0 : i64, tpu.core_type = #tpu.core_type<tc>, window_params = [{transform_indices = @transform_0, window_bounds = array<i64: 16, 128>}, {transform_indices = @transform_1, window_bounds = array<i64: 1, 8, 128>}]} {
    %c0_i32 = arith.constant 0 : i32
    %0 = arith.cmpi eq, %arg1, %c0_i32 : i32
    %1 = arith.extui %0 : i1 to i32
    %c0_i32_0 = arith.constant 0 : i32
    %2 = arith.cmpi ne, %1, %c0_i32_0 : i32
    scf.if %2 {
      %cst_10 = arith.constant 0.000000e+00 : f32
      %22 = vector.broadcast %cst_10 : f32 to vector<1x8x128xf32>
      %c0_11 = arith.constant 0 : index
      %c0_12 = arith.constant 0 : index
      %c0_13 = arith.constant 0 : index
      %23 = vector.load %arg3[%c0_11, %c0_12, %c0_13] : memref<1x8x128xf32, #tpu.memory_space<vmem>>, vector<1x8x128xf32>
      tpu.vector_store %arg3[%c0_11, %c0_12, %c0_13], %22 {strides = array<i32>} : memref<1x8x128xf32, #tpu.memory_space<vmem>>, vector<1x8x128xf32>,
    } else {
    }
    %c0 = arith.constant 0 : index
    %c0_1 = arith.constant 0 : index
    %3 = vector.load %arg2[%c0, %c0_1] : memref<16x128xf32, #tpu.memory_space<vmem>>, vector<16x128xf32>
    %c1_i32 = arith.constant 1 : i32
    %4 = arith.muli %arg0, %c1_i32 : i32
    %5 = arith.addi %4, %arg1 : i32
    %c16_i32 = arith.constant 16 : i32
    %6 = arith.muli %5, %c16_i32 : i32
    %7 = tpu.iota {dimensions = array<i32: 0>} : vector<16x128xi32>
    %8 = vector.broadcast %6 : i32 to vector<16x128xi32>
    %9 = arith.addi %8, %7 : vector<16x128xi32>
    %c16_i32_2 = arith.constant 16 : i32
    %10 = vector.broadcast %c16_i32_2 : i32 to vector<16x128xi32>
    %11 = arith.cmpi slt, %9, %10 : vector<16x128xi32>
    %cst = arith.constant 0.000000e+00 : f32
    %12 = vector.broadcast %cst : f32 to vector<16x128xf32>
    %13 = arith.select %11, %3, %12 : vector<16x128xi1>, vector<16x128xf32>
    %c0_3 = arith.constant 0 : index
    %c0_4 = arith.constant 0 : index
    %c0_5 = arith.constant 0 : index
    %14 = vector.load %arg3[%c0_3, %c0_4, %c0_5] : memref<1x8x128xf32, #tpu.memory_space<vmem>>, vector<1x8x128xf32>
    %15 = vector.shape_cast %14 : vector<1x8x128xf32> to vector<8x128xf32>
    %16 = vector.shape_cast %13 : vector<16x128xf32> to vector<2x8x128xf32>
    %cst_6 = arith.constant dense<0.000000e+00> : vector<8x128xf32>
    %17 = vector.multi_reduction <add>, %16, %cst_6 [0] : vector<2x8x128xf32> to vector<8x128xf32>
    %18 = arith.addf %15, %17 : vector<8x128xf32>
    %c0_7 = arith.constant 0 : index
    %c0_8 = arith.constant 0 : index
    %c0_9 = arith.constant 0 : index
    %19 = vector.load %arg3[%c0_7, %c0_8, %c0_9] : memref<1x8x128xf32, #tpu.memory_space<vmem>>, vector<1x8x128xf32>
    %20 = vector.shape_cast %19 : vector<1x8x128xf32> to vector<8x128xf32>
    %21 = vector.shape_cast %18 : vector<8x128xf32> to vector<1x8x128xf32>
    tpu.vector_store %arg3[%c0_7, %c0_8, %c0_9], %21 {strides = array<i32>} : memref<1x8x128xf32, #tpu.memory_space<vmem>>, vector<1x8x128xf32>,
    return
  }
  func.func @transform_0(%arg0: i32, %arg1: i32) -> (i32, i32) {
    %c1_i32 = arith.constant 1 : i32
    %0 = arith.muli %arg0, %c1_i32 : i32
    %1 = arith.addi %0, %arg1 : i32
    %c0_i32 = arith.constant 0 : i32
    %2 = arith.minsi %1, %c0_i32 : i32
    %c0_i32_0 = arith.constant 0 : i32
    %c0_i32_1 = arith.constant 0 : i32
    return %2, %c0_i32_0 : i32, i32
  }
  func.func @transform_1(%arg0: i32, %arg1: i32) -> (i32, i32, i32) {
    %c0_i32 = arith.constant 0 : i32
    %c0_i32_0 = arith.constant 0 : i32
    %c0_i32_1 = arith.constant 0 : i32
    return %arg0, %c0_i32, %c0_i32_0 : i32, i32, i32
  }
}

</mosaic_0001>

<bundles_post_ra>
// kernel: wasserstein_generator_loss.1
= control target key start
LH: loop header
LB: loop body
LE: loop exit
PB: predicated region body
PF: predicated region fallthrough
CT: control target
= control target key end

     0   :  { %s304_s6 = smov 0   ;;  %s306_s7 = smov 0   ;;  %s337_s0 = inlined_call_operand.vmem [shape: f32[16,128], index: 0, kind: input, shape index: {}]   ;;  %s338_s1 = inlined_call_operand.vmem [shape: f32[2,8,128], index: 1, kind: output, shape index: {}]  }
   0x1   :  { %s308_s8 = smov 0  }
   0x2 LB: > { %s23_s9 = sadd.s32 1, %s288_s7  ;;  %p238_p0 = scmp.ge.s32.totalorder %s292_s8, 1  ;;  %s292_s8 = sphi %s308_s8, %s11_s8   ;;  %s288_s7 = sphi %s306_s7, %s340_s7   ;;  %s284_s6 = sphi %s304_s6, %s339_s6  }
   0x3   : > { %p25_p1 = scmp.ge.s32.totalorder %s23_s9, 2  ;;  %p112_p2 = scmp.lt.s32.totalorder %s292_s8, 3 }
   0x5   : > { %s342_s9 = smov (%p25_p1, %s23_s9), 0  ;;  %p113_p3 = pnand %p238_p0, %p112_p2 }
   0x6   : > { %p135_p4 = scmp.lt.s32.totalorder (!%p113_p3), %s284_s6, 0  ;;  %v159_v0 = vlaneseq (!%p113_p3)  ;;  %s242_s10 = sshll.u32 (!%p113_p3), %s284_s6, 4 }
   0x7   : > { %116 = sbr.rel (%p113_p3) target bundleno = 27 (0x1b), region = 24  ;;  %p146_p5 = scmp.lt.s32.totalorder (!%p113_p3), %s284_s6, 1  ;;  %v162_v2 = vstv (!%p113_p3), %s242_s10 }
   0x8   : > { %v160_v1 = vshrl.u32 (!%p113_p3), %v159_v0, 7 }
   0xa   : > { %v161_v3 = vadd.s32 (!%p113_p3), 8, %v160_v1  ;;  %v163_v4 = vadd.s32 (!%p113_p3), %v162_v2, %v160_v1 }
   0xc   : > { %v164_v5 = vadd.s32 (!%p113_p3), %v162_v2, %v161_v3  ;;  %vm165_vm0 = vcmp.lt.s32.totalorder (!%p113_p3), %v163_v4, 16 }
   0xe   : > { %s136_s11 = scalar_select %p135_p4, %s284_s6, 0  ;;  %vm166_vm1 = vcmp.lt.s32.totalorder %v164_v5, 16 }
   0xf   : > { %s344_s6 = smov (!%p146_p5, %s284_s6), 1 }
  0x10   : > { %s239_s12 = sshll.u32 %s136_s11, 1  ;;  %s241_s17 = sshll.u32 %s344_s6, 3 }
  0x11   : > { %p138_p6 = scmp.lt.s32.totalorder %s239_s12, 1  ;;  %s149_s20 = scalar_lea.vmem %s338_s1, %s241_s17 }
  0x13   : > { %s346_s12 = smov (!%p138_p6, %s239_s12), 1 }
  0x14   : > { %s240_s13 = sshll.u32 %s346_s12, 3 }
  0x15   : > { %s141_s16 = scalar_lea.vmem %s337_s0, %s240_s13 }
  0x16   : > { %v155_v6 = vld [vmem:[%s141_s16] sm:$0xff]  ;;  %v156_v7 = vld [vmem:[%s141_s16 + $0x8] sm:$0xff] }
  0x17   : > { %v167_v8 = vsel %vm165_vm0, %v155_v6, 0.0  ;;  %v168_v9 = vsel %vm166_vm1, %v156_v7, 0.0 }
  0x18   : > { %v170_v10 = vadd.f32 %v168_v9, %v167_v8 }
  0x1a   : > { %172 = vst [vmem:[%s149_s20] sm:$0xff] %v170_v10 }
  0x1b PF: > { %s11_s8 = sadd.s32 1, %s292_s8   ;;  %s339_s6 = smov %s288_s7 }
  0x1c   : > { %p8_p7 = scmp.ge.s32.totalorder %s11_s8, 4   ;;  %s340_s7 = smov %s342_s9 }
  0x1e   :  { %10 = sbr.rel (!%p8_p7) target bundleno = 2 (0x2), region = 58 }

</bundles_post_ra>
